<compile_context>
chip_gen: v6e
topology: v6e:2x2x1
jax: 0.10.0
libtpu: 0.0.40
codegen_flags: <defaults>
</compile_context>

<pallas_src>
import jax
import jax.numpy as jnp
import numpy as np
from jax import lax
from jax.experimental import pallas as pl
from jax.experimental.pallas import tpu as pltpu

LAYERS = (29, 16, 8, 4)
COMP_DIM = 1
N_GMM = 2
LATENT_DIM = 2 + COMP_DIM                    # enc (1) + rec_euclidean + rec_cosine
OUT_ROWS = LAYERS[0] + LATENT_DIM + N_GMM    # dec | z | gamma  ->  34 sublane rows

# (fan_in, fan_out) of every Linear, in forward order:
#   encoder (29->16->8->4->1), decoder (1->4->8->16->29), estimation (3->10->2)
PARAM_DIMS = (
    (LAYERS[0], LAYERS[1]), (LAYERS[1], LAYERS[2]), (LAYERS[2], LAYERS[3]),
    (LAYERS[3], COMP_DIM),
    (COMP_DIM, LAYERS[3]), (LAYERS[3], LAYERS[2]), (LAYERS[2], LAYERS[1]),
    (LAYERS[1], LAYERS[0]),
    (LATENT_DIM, 10), (10, N_GMM),
)

# Packed parameter slab (feature-major orientation):
#   layer idx occupies sublane rows [ROW_OFF[idx], ROW_OFF[idx]+fout)
#   (row offsets rounded up to multiples of 8 = sublane alignment);
#   W (fout, fin) sits in cols [0, fin), bias (fout,) sits in column BIAS_COL.
_offs, _r = [], 0
for _fin, _fout in PARAM_DIMS:
    _offs.append(_r)
    _r += -(-_fout // 8) * 8
ROW_OFF = tuple(_offs)
SLAB_ROWS = _r                               # 128
SLAB_COLS = 32                               # >= max fan_in (29) + 1 bias column
BIAS_COL = 30


def dagmm_kernel(x_ref, p_ref, out_ref):
    f32 = jnp.float32
    x = x_ref[...]                                            # (29, tb)

    def w_of(idx):
        fin, fout = PARAM_DIMS[idx]
        r = ROW_OFF[idx]
        return p_ref[r:r + fout, :fin]                        # (fout, fin)

    def b_of(idx):
        _, fout = PARAM_DIMS[idx]
        r = ROW_OFF[idx]
        return p_ref[r:r + fout, BIAS_COL:BIAS_COL + 1]       # (fout, 1)

    def linear(h, idx):
        return jnp.dot(w_of(idx), h, preferred_element_type=f32) + b_of(idx)

    # ---- encoder: (Linear + Tanh) x3, then Linear(4 -> 1) ----
    h = jnp.tanh(linear(x, 0))                                # (16, tb)
    h = jnp.tanh(linear(h, 1))                                # (8, tb)
    h = jnp.tanh(linear(h, 2))                                # (4, tb)
    enc = linear(h, 3)                                        # (1, tb)

    # ---- decoder: Linear(1 -> 4) as broadcast FMA, then (Tanh, Linear) x3 ----
    d = jnp.tanh(w_of(4) * enc + b_of(4))                     # (4, tb)
    d = jnp.tanh(linear(d, 5))                                # (8, tb)
    d = jnp.tanh(linear(d, 6))                                # (16, tb)
    dec = linear(d, 7)                                        # (29, tb)

    # ---- distance features: feature reductions as ones-vector dots (MXU is idle)
    ones_row = jnp.ones((1, LAYERS[0]), f32)
    diff = x - dec
    sum_xx = jnp.dot(ones_row, x * x, preferred_element_type=f32)       # (1, tb)
    sum_dd = jnp.dot(ones_row, dec * dec, preferred_element_type=f32)
    sum_xd = jnp.dot(ones_row, x * dec, preferred_element_type=f32)
    sum_d2 = jnp.dot(ones_row, diff * diff, preferred_element_type=f32)

    rec_eucl = jnp.sqrt(jnp.maximum(sum_d2, 0.0)) * lax.rsqrt(jnp.maximum(sum_xx, 1e-24))
    rec_cos = sum_xd * lax.rsqrt(jnp.maximum(sum_xx * sum_dd, 1e-16))

    # ---- estimation: Linear(3,10) as 3 broadcast FMAs (no z concat), Tanh,
    #      Dropout(identity), Linear(10,2), 2-way softmax (lane-dense) ----
    # TODO(synk): nn.Dropout(p=0.5) is identity at inference; training-mode mask not implemented.
    w8 = w_of(8)                                              # (10, 3)
    g = jnp.tanh(w8[:, 0:1] * enc + w8[:, 1:2] * rec_eucl
                 + w8[:, 2:3] * rec_cos + b_of(8))            # (10, tb)
    logits = linear(g, 9)                                     # (2, tb)

    l0 = logits[0:1, :]
    l1 = logits[1:2, :]
    m = jnp.maximum(l0, l1)
    e0 = jnp.exp(l0 - m)
    e1 = jnp.exp(l1 - m)
    inv = pl.reciprocal(e0 + e1, approx=True)

    # ---- lane-dense fused output block: rows = [dec | enc | eucl | cos | gamma]
    r0 = LAYERS[0]
    out_ref[0:r0, :] = dec
    out_ref[r0:r0 + 1, :] = enc
    out_ref[r0 + 1:r0 + 2, :] = rec_eucl
    out_ref[r0 + 2:r0 + 3, :] = rec_cos
    out_ref[r0 + 3:r0 + 4, :] = e0 * inv
    out_ref[r0 + 4:r0 + 5, :] = e1 * inv


def dagmm_forward(x, param_slab, tb=2048):
    """x: (n, 29) f32.  Returns (enc, dec, z, gamma) in batch-major layout."""
    n, f = x.shape
    assert f == LAYERS[0]

    # Batch tile along the lane axis: multiple of 128, clamped to the batch.
    tb = max(128, (int(tb) // 128) * 128)
    tb = min(tb, pl.cdiv(n, 128) * 128)
    n_pad = pl.cdiv(n, tb) * tb

    xt = x.T                                                  # (29, n)
    if n_pad != n:
        xt = jnp.pad(xt, ((0, 0), (0, n_pad - n)), constant_values=1.0)

    out = pl.pallas_call(
        dagmm_kernel,
        grid=(n_pad // tb,),
        in_specs=[
            pl.BlockSpec((LAYERS[0], tb), lambda i: (0, i)),
            # parameter slab: constant block index -> stays resident in VMEM
            pl.BlockSpec((SLAB_ROWS, SLAB_COLS), lambda i: (0, 0)),
        ],
        out_specs=pl.BlockSpec((OUT_ROWS, tb), lambda i: (0, i)),
        out_shape=jax.ShapeDtypeStruct((OUT_ROWS, n_pad), jnp.float32),
        compiler_params=pltpu.CompilerParams(
            dimension_semantics=("parallel",),
            vmem_limit_bytes=16 * 1024 * 1024),
    )(xt, param_slab)

    dec = out[:LAYERS[0], :n].T
    z = out[LAYERS[0]:LAYERS[0] + LATENT_DIM, :n].T
    enc = z[:, :COMP_DIM]
    gamma = out[LAYERS[0] + LATENT_DIM:, :n].T
    return enc, dec, z, gamma


def init_params(key):
    """PyTorch-orientation params: W (fan_out, fan_in), b (fan_out,), U(+-1/sqrt(fan_in))."""
    params = []
    for fin, fout in PARAM_DIMS:
        key, kw, kb = jax.random.split(key, 3)
        bound = 1.0 / float(np.sqrt(fin))
        w = jax.random.uniform(kw, (fout, fin), jnp.float32, -bound, bound)
        b = jax.random.uniform(kb, (fout,), jnp.float32, -bound, bound)
        params.append((w, b))
    return params


def pack_params(params):
    """Pack all (W, b) into one (SLAB_ROWS, SLAB_COLS) f32 slab, 8-row aligned per layer."""
    slab = np.zeros((SLAB_ROWS, SLAB_COLS), np.float32)
    for idx, (w, b) in enumerate(params):
        fin, fout = PARAM_DIMS[idx]
        r = ROW_OFF[idx]
        slab[r:r + fout, :fin] = np.asarray(w)
        slab[r:r + fout, BIAS_COL] = np.asarray(b)
    return jnp.asarray(slab)


def dagmm_ref(x, params):
    """Pure-JAX reference of the PyTorch forward (weights in (out, in) orientation)."""
    enc_p, dec_p, est_p = params[0:4], params[4:8], params[8:10]
    h = x
    for w, b in enc_p[:-1]:
        h = jnp.tanh(h @ w.T + b)
    enc = h @ enc_p[-1][0].T + enc_p[-1][1]

    d = enc @ dec_p[0][0].T + dec_p[0][1]
    for w, b in dec_p[1:]:
        d = jnp.tanh(d) @ w.T + b
    dec = d

    x_norm = jnp.linalg.norm(x, axis=1)
    d_norm = jnp.linalg.norm(dec, axis=1)
    rec_eucl = jnp.linalg.norm(x - dec, axis=1) / x_norm
    rec_cos = jnp.sum(x * dec, axis=1) / jnp.maximum(x_norm * d_norm, 1e-8)
    z = jnp.concatenate([enc, rec_eucl[:, None], rec_cos[:, None]], axis=1)

    g = jnp.tanh(z @ est_p[0][0].T + est_p[0][1])
    gamma = jax.nn.softmax(g @ est_p[1][0].T + est_p[1][1], axis=1)
    return enc, dec, z, gamma


if __name__ == "__main__":
    key = jax.random.PRNGKey(0)
    k_x, k_p = jax.random.split(key)

    N = 200                                   # deliberately NOT a multiple of tb
    x = jax.random.normal(k_x, (N, LAYERS[0]), jnp.float32)
    params = init_params(k_p)
    slab = pack_params(params)

    outs = dagmm_forward(x, slab, tb=128)     # grid of 2 even at this small N
    outs = jax.block_until_ready(outs)

    refs = dagmm_ref(x, params)
    for o, r in zip(outs, refs):
        np.testing.assert_allclose(np.asarray(o), np.asarray(r),
                                   rtol=2e-2, atol=2e-2)
    print("KERNEL_OK")
</pallas_src>

<mosaic_0001>
module attributes {stable_mosaic.version = 11 : i64} {
  func.func @dagmm_kernel(%arg0: i32, %arg1: memref<29x128xf32, #tpu.memory_space<vmem>>, %arg2: memref<128x32xf32, #tpu.memory_space<vmem>>, %arg3: memref<34x128xf32, #tpu.memory_space<vmem>>) attributes {dimension_semantics = [#tpu.dimension_semantics<parallel>], iteration_bounds = array<i64: 2>, scalar_prefetch = 0 : i64, scratch_operands = 0 : i64, tpu.core_type = #tpu.core_type<tc>, window_params = [{transform_indices = @transform_0, window_bounds = array<i64: 29, 128>}, {pipeline_mode = #tpu.pipeline_mode<synchronous>, transform_indices = @transform_1, window_bounds = array<i64: 128, 32>}, {transform_indices = @transform_2, window_bounds = array<i64: 34, 128>}]} {
    %c0 = arith.constant 0 : index
    %c0_0 = arith.constant 0 : index
    %0 = vector.load %arg1[%c0, %c0_0] : memref<29x128xf32, #tpu.memory_space<vmem>>, vector<29x128xf32>
    %c0_1 = arith.constant 0 : index
    %c0_2 = arith.constant 0 : index
    %1 = vector.load %arg2[%c0_1, %c0_2] : memref<128x32xf32, #tpu.memory_space<vmem>>, vector<16x29xf32>
    %cst = arith.constant dense<0.000000e+00> : vector<16x128xf32>
    %2 = tpu.matmul %1, %0, %cst {dimension_numbers = #tpu.dot_dimension_numbers<[1], [0], [0], [1], [0, 0, 1, 1], [], []>} : vector<16x29xf32>, vector<29x128xf32>, vector<16x128xf32> -> vector<16x128xf32>
    %c0_3 = arith.constant 0 : index
    %c30 = arith.constant 30 : index
    %3 = vector.load %arg2[%c0_3, %c30] : memref<128x32xf32, #tpu.memory_space<vmem>>, vector<16x1xf32>
    %4 = vector.broadcast %3 : vector<16x1xf32> to vector<16x128xf32>
    %5 = arith.addf %2, %4 : vector<16x128xf32>
    %6 = math.tanh %5 : vector<16x128xf32>
    %c16 = arith.constant 16 : index
    %c0_4 = arith.constant 0 : index
    %7 = vector.load %arg2[%c16, %c0_4] : memref<128x32xf32, #tpu.memory_space<vmem>>, vector<8x16xf32>
    %cst_5 = arith.constant dense<0.000000e+00> : vector<8x128xf32>
    %8 = tpu.matmul %7, %6, %cst_5 {dimension_numbers = #tpu.dot_dimension_numbers<[1], [0], [0], [1], [0, 0, 1, 1], [], []>} : vector<8x16xf32>, vector<16x128xf32>, vector<8x128xf32> -> vector<8x128xf32>
    %c16_6 = arith.constant 16 : index
    %c30_7 = arith.constant 30 : index
    %9 = vector.load %arg2[%c16_6, %c30_7] : memref<128x32xf32, #tpu.memory_space<vmem>>, vector<8x1xf32>
    %10 = vector.broadcast %9 : vector<8x1xf32> to vector<8x128xf32>
    %11 = arith.addf %8, %10 : vector<8x128xf32>
    %12 = math.tanh %11 : vector<8x128xf32>
    %c24 = arith.constant 24 : index
    %c0_8 = arith.constant 0 : index
    %13 = vector.load %arg2[%c24, %c0_8] : memref<128x32xf32, #tpu.memory_space<vmem>>, vector<4x8xf32>
    %cst_9 = arith.constant dense<0.000000e+00> : vector<4x128xf32>
    %14 = tpu.matmul %13, %12, %cst_9 {dimension_numbers = #tpu.dot_dimension_numbers<[1], [0], [0], [1], [0, 0, 1, 1], [], []>} : vector<4x8xf32>, vector<8x128xf32>, vector<4x128xf32> -> vector<4x128xf32>
    %c24_10 = arith.constant 24 : index
    %c30_11 = arith.constant 30 : index
    %15 = vector.load %arg2[%c24_10, %c30_11] : memref<128x32xf32, #tpu.memory_space<vmem>>, vector<4x1xf32>
    %16 = vector.broadcast %15 : vector<4x1xf32> to vector<4x128xf32>
    %17 = arith.addf %14, %16 : vector<4x128xf32>
    %18 = math.tanh %17 : vector<4x128xf32>
    %c32 = arith.constant 32 : index
    %c0_12 = arith.constant 0 : index
    %19 = vector.load %arg2[%c32, %c0_12] : memref<128x32xf32, #tpu.memory_space<vmem>>, vector<1x4xf32>
    %cst_13 = arith.constant dense<0.000000e+00> : vector<1x128xf32>
    %20 = tpu.matmul %19, %18, %cst_13 {dimension_numbers = #tpu.dot_dimension_numbers<[1], [0], [0], [1], [0, 0, 1, 1], [], []>} : vector<1x4xf32>, vector<4x128xf32>, vector<1x128xf32> -> vector<1x128xf32>
    %c32_14 = arith.constant 32 : index
    %c30_15 = arith.constant 30 : index
    %21 = vector.load %arg2[%c32_14, %c30_15] : memref<128x32xf32, #tpu.memory_space<vmem>>, vector<1x1xf32>
    %22 = vector.broadcast %21 : vector<1x1xf32> to vector<1x128xf32>
    %23 = arith.addf %20, %22 : vector<1x128xf32>
    %c40 = arith.constant 40 : index
    %c0_16 = arith.constant 0 : index
    %24 = vector.load %arg2[%c40, %c0_16] : memref<128x32xf32, #tpu.memory_space<vmem>>, vector<4x1xf32>
    %25 = vector.broadcast %24 : vector<4x1xf32> to vector<4x128xf32>
    %26 = vector.broadcast %23 : vector<1x128xf32> to vector<4x128xf32>
    %27 = arith.mulf %25, %26 : vector<4x128xf32>
    %c40_17 = arith.constant 40 : index
    %c30_18 = arith.constant 30 : index
    %28 = vector.load %arg2[%c40_17, %c30_18] : memref<128x32xf32, #tpu.memory_space<vmem>>, vector<4x1xf32>
    %29 = vector.broadcast %28 : vector<4x1xf32> to vector<4x128xf32>
    %30 = arith.addf %27, %29 : vector<4x128xf32>
    %31 = math.tanh %30 : vector<4x128xf32>
    %c48 = arith.constant 48 : index
    %c0_19 = arith.constant 0 : index
    %32 = vector.load %arg2[%c48, %c0_19] : memref<128x32xf32, #tpu.memory_space<vmem>>, vector<8x4xf32>
    %cst_20 = arith.constant dense<0.000000e+00> : vector<8x128xf32>
    %33 = tpu.matmul %32, %31, %cst_20 {dimension_numbers = #tpu.dot_dimension_numbers<[1], [0], [0], [1], [0, 0, 1, 1], [], []>} : vector<8x4xf32>, vector<4x128xf32>, vector<8x128xf32> -> vector<8x128xf32>
    %c48_21 = arith.constant 48 : index
    %c30_22 = arith.constant 30 : index
    %34 = vector.load %arg2[%c48_21, %c30_22] : memref<128x32xf32, #tpu.memory_space<vmem>>, vector<8x1xf32>
    %35 = vector.broadcast %34 : vector<8x1xf32> to vector<8x128xf32>
    %36 = arith.addf %33, %35 : vector<8x128xf32>
    %37 = math.tanh %36 : vector<8x128xf32>
    %c56 = arith.constant 56 : index
    %c0_23 = arith.constant 0 : index
    %38 = vector.load %arg2[%c56, %c0_23] : memref<128x32xf32, #tpu.memory_space<vmem>>, vector<16x8xf32>
    %cst_24 = arith.constant dense<0.000000e+00> : vector<16x128xf32>
    %39 = tpu.matmul %38, %37, %cst_24 {dimension_numbers = #tpu.dot_dimension_numbers<[1], [0], [0], [1], [0, 0, 1, 1], [], []>} : vector<16x8xf32>, vector<8x128xf32>, vector<16x128xf32> -> vector<16x128xf32>
    %c56_25 = arith.constant 56 : index
    %c30_26 = arith.constant 30 : index
    %40 = vector.load %arg2[%c56_25, %c30_26] : memref<128x32xf32, #tpu.memory_space<vmem>>, vector<16x1xf32>
    %41 = vector.broadcast %40 : vector<16x1xf32> to vector<16x128xf32>
    %42 = arith.addf %39, %41 : vector<16x128xf32>
    %43 = math.tanh %42 : vector<16x128xf32>
    %c72 = arith.constant 72 : index
    %c0_27 = arith.constant 0 : index
    %44 = vector.load %arg2[%c72, %c0_27] : memref<128x32xf32, #tpu.memory_space<vmem>>, vector<29x16xf32>
    %cst_28 = arith.constant dense<0.000000e+00> : vector<29x128xf32>
    %45 = tpu.matmul %44, %43, %cst_28 {dimension_numbers = #tpu.dot_dimension_numbers<[1], [0], [0], [1], [0, 0, 1, 1], [], []>} : vector<29x16xf32>, vector<16x128xf32>, vector<29x128xf32> -> vector<29x128xf32>
    %c72_29 = arith.constant 72 : index
    %c30_30 = arith.constant 30 : index
    %46 = vector.load %arg2[%c72_29, %c30_30] : memref<128x32xf32, #tpu.memory_space<vmem>>, vector<29x1xf32>
    %47 = vector.broadcast %46 : vector<29x1xf32> to vector<29x128xf32>
    %48 = arith.addf %45, %47 : vector<29x128xf32>
    %cst_31 = arith.constant 1.000000e+00 : f32
    %49 = vector.broadcast %cst_31 : f32 to vector<1x29xf32>
    %50 = arith.subf %0, %48 : vector<29x128xf32>
    %51 = arith.mulf %0, %0 : vector<29x128xf32>
    %cst_32 = arith.constant dense<0.000000e+00> : vector<1x128xf32>
    %52 = tpu.matmul %49, %51, %cst_32 {dimension_numbers = #tpu.dot_dimension_numbers<[1], [0], [0], [1], [0, 0, 1, 1], [], []>} : vector<1x29xf32>, vector<29x128xf32>, vector<1x128xf32> -> vector<1x128xf32>
    %53 = arith.mulf %48, %48 : vector<29x128xf32>
    %cst_33 = arith.constant dense<0.000000e+00> : vector<1x128xf32>
    %54 = tpu.matmul %49, %53, %cst_33 {dimension_numbers = #tpu.dot_dimension_numbers<[1], [0], [0], [1], [0, 0, 1, 1], [], []>} : vector<1x29xf32>, vector<29x128xf32>, vector<1x128xf32> -> vector<1x128xf32>
    %55 = arith.mulf %0, %48 : vector<29x128xf32>
    %cst_34 = arith.constant dense<0.000000e+00> : vector<1x128xf32>
    %56 = tpu.matmul %49, %55, %cst_34 {dimension_numbers = #tpu.dot_dimension_numbers<[1], [0], [0], [1], [0, 0, 1, 1], [], []>} : vector<1x29xf32>, vector<29x128xf32>, vector<1x128xf32> -> vector<1x128xf32>
    %57 = arith.mulf %50, %50 : vector<29x128xf32>
    %cst_35 = arith.constant dense<0.000000e+00> : vector<1x128xf32>
    %58 = tpu.matmul %49, %57, %cst_35 {dimension_numbers = #tpu.dot_dimension_numbers<[1], [0], [0], [1], [0, 0, 1, 1], [], []>} : vector<1x29xf32>, vector<29x128xf32>, vector<1x128xf32> -> vector<1x128xf32>
    %cst_36 = arith.constant 0.000000e+00 : f32
    %59 = vector.broadcast %cst_36 : f32 to vector<1x128xf32>
    %60 = arith.maximumf %58, %59 : vector<1x128xf32>
    %61 = math.sqrt %60 : vector<1x128xf32>
    %cst_37 = arith.constant 1.000000e-24 : f32
    %62 = vector.broadcast %cst_37 : f32 to vector<1x128xf32>
    %63 = arith.maximumf %52, %62 : vector<1x128xf32>
    %64 = math.rsqrt %63 : vector<1x128xf32>
    %65 = arith.mulf %61, %64 : vector<1x128xf32>
    %66 = arith.mulf %52, %54 : vector<1x128xf32>
    %cst_38 = arith.constant 1.000000e-16 : f32
    %67 = vector.broadcast %cst_38 : f32 to vector<1x128xf32>
    %68 = arith.maximumf %66, %67 : vector<1x128xf32>
    %69 = math.rsqrt %68 : vector<1x128xf32>
    %70 = arith.mulf %56, %69 : vector<1x128xf32>
    %c104 = arith.constant 104 : index
    %c0_39 = arith.constant 0 : index
    %71 = vector.load %arg2[%c104, %c0_39] : memref<128x32xf32, #tpu.memory_space<vmem>>, vector<10x3xf32>
    %72 = vector.extract_strided_slice %71 {offsets = [0, 0], sizes = [10, 1], strides = [1, 1]} : vector<10x3xf32> to vector<10x1xf32>
    %73 = vector.broadcast %72 : vector<10x1xf32> to vector<10x128xf32>
    %74 = vector.broadcast %23 : vector<1x128xf32> to vector<10x128xf32>
    %75 = arith.mulf %73, %74 : vector<10x128xf32>
    %76 = vector.extract_strided_slice %71 {offsets = [0, 1], sizes = [10, 1], strides = [1, 1]} : vector<10x3xf32> to vector<10x1xf32>
    %77 = vector.broadcast %76 : vector<10x1xf32> to vector<10x128xf32>
    %78 = vector.broadcast %65 : vector<1x128xf32> to vector<10x128xf32>
    %79 = arith.mulf %77, %78 : vector<10x128xf32>
    %80 = arith.addf %75, %79 : vector<10x128xf32>
    %81 = vector.extract_strided_slice %71 {offsets = [0, 2], sizes = [10, 1], strides = [1, 1]} : vector<10x3xf32> to vector<10x1xf32>
    %82 = vector.broadcast %81 : vector<10x1xf32> to vector<10x128xf32>
    %83 = vector.broadcast %70 : vector<1x128xf32> to vector<10x128xf32>
    %84 = arith.mulf %82, %83 : vector<10x128xf32>
    %85 = arith.addf %80, %84 : vector<10x128xf32>
    %c104_40 = arith.constant 104 : index
    %c30_41 = arith.constant 30 : index
    %86 = vector.load %arg2[%c104_40, %c30_41] : memref<128x32xf32, #tpu.memory_space<vmem>>, vector<10x1xf32>
    %87 = vector.broadcast %86 : vector<10x1xf32> to vector<10x128xf32>
    %88 = arith.addf %85, %87 : vector<10x128xf32>
    %89 = math.tanh %88 : vector<10x128xf32>
    %c120 = arith.constant 120 : index
    %c0_42 = arith.constant 0 : index
    %90 = vector.load %arg2[%c120, %c0_42] : memref<128x32xf32, #tpu.memory_space<vmem>>, vector<2x10xf32>
    %cst_43 = arith.constant dense<0.000000e+00> : vector<2x128xf32>
    %91 = tpu.matmul %90, %89, %cst_43 {dimension_numbers = #tpu.dot_dimension_numbers<[1], [0], [0], [1], [0, 0, 1, 1], [], []>} : vector<2x10xf32>, vector<10x128xf32>, vector<2x128xf32> -> vector<2x128xf32>
    %c120_44 = arith.constant 120 : index
    %c30_45 = arith.constant 30 : index
    %92 = vector.load %arg2[%c120_44, %c30_45] : memref<128x32xf32, #tpu.memory_space<vmem>>, vector<2x1xf32>
    %93 = vector.broadcast %92 : vector<2x1xf32> to vector<2x128xf32>
    %94 = arith.addf %91, %93 : vector<2x128xf32>
    %95 = vector.extract_strided_slice %94 {offsets = [0, 0], sizes = [1, 128], strides = [1, 1]} : vector<2x128xf32> to vector<1x128xf32>
    %96 = vector.extract_strided_slice %94 {offsets = [1, 0], sizes = [1, 128], strides = [1, 1]} : vector<2x128xf32> to vector<1x128xf32>
    %97 = arith.maximumf %95, %96 : vector<1x128xf32>
    %98 = arith.subf %95, %97 : vector<1x128xf32>
    %99 = math.exp %98 : vector<1x128xf32>
    %100 = arith.subf %96, %97 : vector<1x128xf32>
    %101 = math.exp %100 : vector<1x128xf32>
    %102 = arith.addf %99, %101 : vector<1x128xf32>
    %103 = tpu.reciprocal %102 {approx = true} : vector<1x128xf32> -> vector<1x128xf32>
    %c0_46 = arith.constant 0 : index
    %c0_47 = arith.constant 0 : index
    %104 = vector.load %arg3[%c0_46, %c0_47] : memref<34x128xf32, #tpu.memory_space<vmem>>, vector<29x128xf32>
    tpu.vector_store %arg3[%c0_46, %c0_47], %48 {strides = array<i32>} : memref<34x128xf32, #tpu.memory_space<vmem>>, vector<29x128xf32>,
    %c29 = arith.constant 29 : index
    %c0_48 = arith.constant 0 : index
    %105 = vector.load %arg3[%c29, %c0_48] : memref<34x128xf32, #tpu.memory_space<vmem>>, vector<1x128xf32>
    tpu.vector_store %arg3[%c29, %c0_48], %23 {strides = array<i32>} : memref<34x128xf32, #tpu.memory_space<vmem>>, vector<1x128xf32>,
    %c30_49 = arith.constant 30 : index
    %c0_50 = arith.constant 0 : index
    %106 = vector.load %arg3[%c30_49, %c0_50] : memref<34x128xf32, #tpu.memory_space<vmem>>, vector<1x128xf32>
    tpu.vector_store %arg3[%c30_49, %c0_50], %65 {strides = array<i32>} : memref<34x128xf32, #tpu.memory_space<vmem>>, vector<1x128xf32>,
    %c31 = arith.constant 31 : index
    %c0_51 = arith.constant 0 : index
    %107 = vector.load %arg3[%c31, %c0_51] : memref<34x128xf32, #tpu.memory_space<vmem>>, vector<1x128xf32>
    tpu.vector_store %arg3[%c31, %c0_51], %70 {strides = array<i32>} : memref<34x128xf32, #tpu.memory_space<vmem>>, vector<1x128xf32>,
    %108 = arith.mulf %99, %103 : vector<1x128xf32>
    %c32_52 = arith.constant 32 : index
    %c0_53 = arith.constant 0 : index
    %109 = vector.load %arg3[%c32_52, %c0_53] : memref<34x128xf32, #tpu.memory_space<vmem>>, vector<1x128xf32>
    tpu.vector_store %arg3[%c32_52, %c0_53], %108 {strides = array<i32>} : memref<34x128xf32, #tpu.memory_space<vmem>>, vector<1x128xf32>,
    %110 = arith.mulf %101, %103 : vector<1x128xf32>
    %c33 = arith.constant 33 : index
    %c0_54 = arith.constant 0 : index
    %111 = vector.load %arg3[%c33, %c0_54] : memref<34x128xf32, #tpu.memory_space<vmem>>, vector<1x128xf32>
    tpu.vector_store %arg3[%c33, %c0_54], %110 {strides = array<i32>} : memref<34x128xf32, #tpu.memory_space<vmem>>, vector<1x128xf32>,
    return
  }
  func.func @transform_0(%arg0: i32) -> (i32, i32) {
    %c0_i32 = arith.constant 0 : i32
    %c0_i32_0 = arith.constant 0 : i32
    return %c0_i32, %arg0 : i32, i32
  }
  func.func @transform_1(%arg0: i32) -> (i32, i32) {
    %c0_i32 = arith.constant 0 : i32
    %c0_i32_0 = arith.constant 0 : i32
    %c0_i32_1 = arith.constant 0 : i32
    return %c0_i32, %c0_i32_0 : i32, i32
  }
  func.func @transform_2(%arg0: i32) -> (i32, i32) {
    %c0_i32 = arith.constant 0 : i32
    %c0_i32_0 = arith.constant 0 : i32
    return %c0_i32, %arg0 : i32, i32
  }
}

</mosaic_0001>

<bundles_post_ra>
// kernel: tpu_custom_call.1
= control target key start
LH: loop header
LB: loop body
LE: loop exit
PB: predicated region body
PF: predicated region fallthrough
CT: control target
= control target key end

     0   :  { %7 = vsyncpa [#allocation4], 0  ;;  %s2112_s0 = inlined_call_operand.vmem [shape: f32[29,256], index: 0, kind: input, shape index: {}]   ;;  %s2113_s1 = inlined_call_operand.vmem [shape: f32[128,32], index: 1, kind: input, shape index: {}]   ;;  %s2114_s2 = inlined_call_operand.hbm [shape: f32[34,256], index: 2, kind: output, shape index: {}]  }
   0x1   :  { %9 = vsyncpa [#allocation4 + $0x1], 0  ;;  %s1789_s9 = smov 0   ;;  %s1791_s10 = smov 0  }
   0x2   :  { %s1793_s11 = smov 0   ;;  %s1795_s12 = smov 0  }
   0x3 LB: > { %s1426_s13 = sadd.s32 4294967295, %s1761_s12   ;;  %s1427_s14 = sadd.s32 4294967294, %s1761_s12   ;;  %s1761_s12 = sphi %s1795_s12, %s2120_s12   ;;  %s1757_s11 = sphi %s1793_s11, %s2119_s11   ;;  %s1753_s10 = sphi %s1791_s10, %s2118_s10   ;;  %s1749_s9 = sphi %s1789_s9, %s2117_s9  }
   0x4   : > { %s1812_s15 = sadd.s32 1, %s1761_s12   ;;  %s22_s16 = sadd.s32 1, %s1757_s11 }
   0x5   : > { %s19_s17 = ssub.s32 %s1761_s12, %s1812_s15  ;;  %p29_p0 = scmp.ne.s32.totalorder %s1757_s11, %s1753_s10 }
   0x6   : > { %p20_p1 = scmp.eq.s32.totalorder %s19_s17, 0  ;;  %p30_p2 = scmp.eq.s32.totalorder %s1761_s12, 0 }
   0x7   : > { %p80_p3 = scmp.eq.s32.totalorder %s1426_s13, 1  ;;  %p85_p4 = scmp.ne.s32.totalorder %s1753_s10, %s1749_s9 }
   0x8   : > { %s1825_s18 = scalar_select %p20_p1, %s1757_s11, %s22_s16  }
   0x9   : > { %p31_p5 = por %p30_p2, %p29_p0  ;;  %p1827_p6 = por %p80_p3, %p29_p0 }
   0xa   : > { %p86_p7 = scmp.eq.s32.totalorder %s1427_s14, 1  ;;  %p1429_p9 = scmp.ge.s32.totalorder %s1761_s12, 2 }
   0xc   : > { %p1831_p8 = por %p86_p7, %p85_p4  ;;  %105 = sbr.rel (%p1429_p9) target bundleno = 23 (0x17), region = 20 }
  0x11   : > { %108 = sbr.rel (!%p31_p5) target bundleno = 23 (0x17), region = 24  ;;  %s110_s21 = sand.u32 (%p31_p5), 1, %s1757_s11  }
  0x12   : > { %s1431_s22 = sshll.u32 (%p31_p5), %s1761_s12, 3  ;;  %s1430_s23 = sshll.u32 (%p31_p5), %s110_s21, 5 }
  0x13   : > { %s114_s26 = scalar_lea.vmem (%p31_p5), %s2112_s0, %s1431_s22  ;;  %s112_s27 = scalar_lea.vmem (%p31_p5), [#allocation2], %s1430_s23 }
  0x14   : > { %v149_v0 = vld [vmem:[%s114_s26] sm:$0xff] (%p31_p5)  ;;  %v151_v1 = vld [vmem:[%s114_s26 + $0x10] sm:$0xff] (%p31_p5) }
  0x15   : > { %v153_v2 = vld [vmem:[%s114_s26 + $0x20] sm:$0xff] (%p31_p5)  ;;  %150 = vst [vmem:[%s112_s27] sm:$0xff] (%p31_p5), %v149_v0  ;;  %152 = vst [vmem:[%s112_s27 + $0x8] sm:$0xff] (%p31_p5), %v151_v1  ;;  %v155_v3 = vld [vmem:[%s114_s26 + $0x30] sm:$0xff] (%p31_p5) }
  0x16   : > { %154 = vst [vmem:[%s112_s27 + $0x10] sm:$0xff] %v153_v2  ;;  %156 = vst [vmem:[%s112_s27 + $0x18] sm:$0xff] %v155_v3 }
  0x17 PF: > { %p1432_p10 = scmp.ge.s32.totalorder %s1761_s12, 1  ;;  %p161_p11 = scmp.lt.s32.totalorder %s1761_s12, 3 }
  0x19   : > { %p162_p12 = pnand %p1432_p10, %p161_p11 }
  0x1a   : > { %s1846_s28 = sand.u32 (!%p162_p12), 1, %s1753_s10   ;;  %s1459_s30 = sshll.u32 (!%p162_p12), %s1426_s13, 7 }
  0x1b   : > { %165 = sbr.rel (%p162_p12) target bundleno = 2029 (0x7ed), region = 62  ;;  %s1433_s3 = sshll.u32 (!%p162_p12), %s1846_s28, 5 }
  0x1c   : > { %s170_s6 = scalar_lea.vmem (!%p162_p12), [#allocation2], %s1433_s3  ;;  %s1608_s24 = smul.u32 (!%p162_p12), 40, %s1846_s28 }
  0x1d   : > { %s2067_s5 = scalar_lea.hbm (!%p162_p12), %s2114_s2, %s1459_s30  ;;  %s1770_s13 = smov (!%p162_p12), [#allocation3]  }
  0x1e   : > { %s1967_s25 = scalar_lea.vmem (!%p162_p12), [#allocation3], %s1608_s24  ;;  %s1705_s8 = sshll.u32 (!%p162_p12), %s1770_s13, 4  ;;  %s1706_s8 = int_to_ptr.vmem [resolvable:$false] %s1705_s8 }
  0x1f   : > { %s1359_s29 = sshll.u32 (!%p162_p12), %s1967_s25, 4  ;;  %s1707_s14 = scalar_lea.vmem (!%p162_p12), %s1706_s8, 1280  ;;  %s2062_s29 = int_to_ptr.vmem [resolvable:$true] %s1359_s29 }
  0x20   : > { %v193_v4 = vld [vmem:[%s2113_s1] sm:$0xff]  ;;  %vm205_vm0 = vcmask 236544   ;;  %vm210_vm1 = vcmask 1044480   ;;  %v194_v5 = vld [vmem:[%s2113_s1 + $0x8] sm:$0xff]  ;;  %v1763_v6 = vmov 30   ;;  %v1860_v8 = vld [vmem:[%s170_s6 + $0x10] sm:$0xff]  ;;  %v540_v45 = vlaneseq  ;;  %p1708_p2 = scmp.lt.s32.totalorder %s2062_s29, %s1706_s8 }
  0x21   : > { %1517 = vmatprep.mubr.msk.f32.mxu0 %vm205_vm0, %v193_v4  ;;  %1658 = vset.pattern.permute.xlu0 %v1763_v6  ;;  %v1858_v7 = vld [vmem:[%s170_s6 + $0x18] sm:$0x1f]  ;;  %v1866_v9 = vld [vmem:[%s170_s6 + $0x8] sm:$0xff]  ;;  %v1870_v10 = vld [vmem:[%s170_s6] sm:$0xff]  ;;  %v1764_v16 = vmov 0.0   ;;  %vm1765_vm2 = vmmov 0  }
  0x22   : > { %202 = vperm.xlu0 %1658, %v194_v5   ;;  %1659 = vset.pattern.permute.xlu1 %v1763_v6  ;;  %v1875_v11 = vld [vmem:[%s2113_s1 + $0x20] sm:$0x1]  ;;  %v534_v12 = vld [vmem:[%s2113_s1 + $0x28] sm:$0xf]  ;;  %v1901_v15 = vld [vmem:[%s2113_s1 + $0x50] sm:$0xff]  ;;  %vm297_vm3 = vcmask 130048  }
  0x23   : > { %1509 = vmatprep.subr.msk.mxu0 %vm210_vm1, %v1858_v7  ;;  %v1889_v13 = vld [vmem:[%s2113_s1 + $0x40] sm:$0xff]  ;;  %1520 = vmatprep.subr.mxu1 %v1764_v16  ;;  %v291_v17 = vld [vmem:[%s2113_s1 + $0x10] sm:$0xff]  ;;  %v371_v18 = vld [vmem:[%s2113_s1 + $0x18] sm:$0xf]  ;;  %vm377_vm4 = vcmask 64512   ;;  %v1766_v32 = vmov 0  }
  0x24   : > { %1510 = vmatpush3.msk.msra.mxu0 %vm210_vm1, %v1858_v7  ;;  %v1895_v14 = vld [vmem:[%s2113_s1 + $0x60] sm:$0x1f]  ;;  %1524 = vmatprep.mubr.msk.f32.mxu1 %vm1765_vm2, %v1764_v16  ;;  %v1928_v33 = vld [vmem:[%s2113_s1 + $0x70] sm:$0x3]  ;;  %v1938_v35 = vld [vmem:[%s2113_s1 + $0x68] sm:$0xff]  ;;  %v1767_v36 = vmov 1  }
  0x25   : > { %1511 = vmatprep.subr.mxu0 %v1860_v8  ;;  %294 = vperm.xlu1 %1659, %v291_v17   ;;  %v551_v34 = vld [vmem:[%s2113_s1 + $0x30] sm:$0xff]  ;;  %v633_v37 = vld [vmem:[%s2113_s1 + $0x38] sm:$0xff]  ;;  %v726_v39 = vld [vmem:[%s2113_s1 + $0x48] sm:$0xff]  ;;  %vm460_vm5 = vcmask 1043456   ;;  %vm457_vm6 = vcmask 31744   ;;  %v541_v46 = vshrl.u32 %v540_v45, 7 }
  0x26   : > { %197 = vperm.xlu0 %1658, %v193_v4   ;;  %1512 = vmatpush3.msra.mxu0 %v1860_v8  ;;  %v1948_v38 = vld [vmem:[%s2113_s1 + $0x58] sm:$0xff]  ;;  %vm1240_vm9 = vcmask 1041408   ;;  %vm1237_vm10 = vcmask 80896   ;;  %s1347_s6 = scalar_lea.sflag [#allocation4], %s1846_s28  ;;  %s1701_s7 = scalar_lea.vmem %s2062_s29, 640 }
  0x27   : > { %1513 = vmatprep.subr.mxu0 %v1866_v9  ;;  %v1962_v47 = vsub.s32 0, %v541_v46  ;;  %p1702_p13 = scmp.ne.s32.totalorder %s2062_s29, %s1701_s7  ;;  %p1709_p3 = scmp.lt.s32.totalorder %s1707_s14, %s1701_s7 }
  0x28   : > { %1514 = vmatpush3.msra.mxu0 %v1866_v9 }
  0x29   : > { %1515 = vmatprep.subr.mxu0 %v1870_v10  ;;  %374 = vperm.xlu1 %1659, %v371_v18   ;;  %p1703_p0 = pnand %p1702_p13, %p1827_p6  ;;  %p1710_p4 = por %p1709_p3, %p1708_p2 }
  0x2a   : > { %454 = vperm.xlu0 %1658, %v1875_v11   ;;  %1516 = vmatpush3.msra.mxu0 %v1870_v10 }
  0x2b   : > { %1518 = vmatmul.mubr.msk.f32.vlgmr.msra.gmra.mxu0 %vm205_vm0, %v194_v5  ;;  %1532 = vmatprep.subr.mxu0 %v1764_v16  ;;  %p1704_p1 = pneg %p1703_p0 }
  0x2c   : > { %1534 = vmatprep.mubr.msk.f32.mxu0 %vm1765_vm2, %v1764_v16 }
  0x2d   : > { %1660 = vset.pattern.permute.xlu1 %v1766_v32  ;;  %p1711_p5 = pnand %p1710_p4, %p1704_p1 }
  0x2e   : > { %546 = vperm.xlu0 %1658, %v534_v12   ;;  %537 = vperm.xlu1 %1660, %v534_v12   ;;  %v850_v12 = vmul.f32 %v1858_v7, %v1858_v7 }
  0x32   : > { %642 = vperm.xlu0 %1658, %v1889_v13   ;;  %1661 = vset.pattern.permute.xlu1 %v1763_v6 }
  0x33   : > { %554 = vperm.xlu1 %1661, %v551_v34  }
  0x36   : > { %747 = vperm.xlu0 %1658, %v1895_v14  }
  0x37   : > { %637 = vperm.xlu1 %1661, %v633_v37  }
  0x3a   : > { %737 = vperm.xlu0 %1658, %v1901_v15  }
  0x3b   : > { %742 = vperm.xlu1 %1661, %v1948_v38  }
  0x3e   : > { %1662 = vset.pattern.permute.xlu0 %v1766_v32 }
  0x3f   : > { %1182 = vperm.xlu0 %1662, %v1928_v33   ;;  %732 = vperm.xlu1 %1661, %v726_v39  }
  0x43   : > { %1665 = vset.pattern.permute.xlu0 %v1767_v36  ;;  %1663 = vset.pattern.permute.xlu1 %v1767_v36 }
  0x44   : > { %1188 = vperm.xlu0 %1665, %v1938_v35   ;;  %1192 = vperm.xlu1 %1663, %v1928_v33  }
  0x48   : > { %1667 = vset.pattern.permute.xlu0 %v1763_v6  ;;  %1664 = vset.pattern.permute.xlu1 %v1766_v32 }
  0x49   : > { %1224 = vperm.xlu0 %1667, %v1928_v33   ;;  %1177 = vperm.xlu1 %1664, %v1938_v35  }
  0x9d   : > { %v203_v19 = vpop.permute.xlu0 %202 }
  0xa0   : > { %v295_v27 = vpop.permute.xlu1 %294 }
  0xa1   : > { %v198_v22 = vpop.permute.xlu0 %197 }
  0xa4   : > { %v375_v40 = vpop.permute.xlu1 %374 }
  0xa5   : > { %v455_v48 = vpop.permute.xlu0 %454 }
  0xa9   : > { %v538_v53 = vpop.permute.xlu1 %537  ;;  %v547_v55 = vpop.permute.xlu0 %546 }
  0xad   : > { %v643_v63 = vpop.permute.xlu0 %642 }
  0xae   : > { %v555_v58 = vpop.permute.xlu1 %554 }
  0xb2   : > { %v638_v2 = vpop.permute.xlu1 %637 }
  0xeb   : > { %v1519_v20 = vpop.f32.mrf.mxu0 }
  0xec   : > { %v286_v21 = vadd.f32 %v1519_v20, %v203_v19  ;;  %v2012_v19 = vld [vmem:[%s2113_s1 + $0x78] sm:$0x3]  ;;  %v748_v20 = vpop.permute.xlu0 %747 }
  0xed   : > { %v280_v23 = vpop.f32.mrf.mxu0 }
  0xee   : > { %1669 = vtanh.f32 %v286_v21  ;;  %v281_v24 = vadd.f32 %v280_v23, %v198_v22  ;;  %v743_v21 = vpop.permute.xlu1 %742 }
  0xf0   : > { %1671 = vtanh.f32 %v281_v24  ;;  %v738_v22 = vpop.permute.xlu0 %737 }
  0xfb   : > { %v1670_v25 = vpop.eup %1669 }
  0xfc   : > { %1521 = vmatpush3.msra.mxu1 %v1670_v25  ;;  %v733_v25 = vpop.permute.xlu1 %732 }
  0xfd   : > { %v1672_v26 = vpop.eup %1671  ;;  %1522 = vmatprep.subr.mxu1 %v1764_v16 }
  0xfe   : > { %1523 = vmatpush3.msra.mxu1 %v1672_v26 }
  0xff   : > { %1525 = vmatmul.mubr.msk.f32.vlgmr.msra.gmra.mxu1 %vm297_vm3, %v291_v17  ;;  %1527 = vmatprep.subr.mxu1 %v1764_v16  ;;  %v1768_v17 = vmov 1.0  }
 0x100   : > { %1529 = vmatprep.mubr.msk.f32.mxu1 %vm1765_vm2, %v1764_v16 }
 0x1bf   : > { %v366_v28 = vpop.f32.mrf.mxu1 }
 0x1c0   : > { %v367_v29 = vadd.f32 %v366_v28, %v295_v27 }
 0x1c1   : > { %v1526_v30 = vpop.f32.mrf.mxu1 }
 0x1c2   : > { %1673 = vtanh.f32 %v367_v29 }
 0x1cf   : > { %v1674_v31 = vpop.eup %1673 }
 0x1d0   : > { %1528 = vmatpush3.msra.mxu1 %v1674_v31 }
 0x1d1   : > { %1530 = vmatmul.mubr.msk.f32.vlgmr.msra.gmra.mxu1 %vm377_vm4, %v371_v18  ;;  %1537 = vmatprep.subr.mxu1 %v1764_v16  ;;  %v1769_v18 = vmov 2  }
 0x1d2   : > { %1539 = vmatprep.mubr.msk.f32.mxu1 %vm1765_vm2, %v1764_v16  ;;  %1666 = vset.pattern.permute.xlu1 %v1769_v18 }
 0x1d3   : > { %1208 = vperm.xlu1 %1666, %v1928_v33  }
 0x1d7   : > { %1204 = vperm.xlu1 %1666, %v1938_v35  }
 0x1db   : > { %1668 = vset.pattern.permute.xlu1 %v1763_v6 }
 0x1dc   : > { %1220 = vperm.xlu1 %1668, %v1938_v35  }
 0x1e0   : > { %1234 = vperm.xlu1 %1668, %v2012_v19  }
 0x291   : > { %v446_v41 = vpop.f32.mrf.mxu1 }
 0x292   : > { %v447_v42 = vadd.f32 %v446_v41, %v375_v40 }
 0x293   : > { %v1531_v43 = vpop.f32.mrf.mxu1 }
 0x294   : > { %1675 = vtanh.f32 %v447_v42 }
 0x2a1   : > { %v1676_v44 = vpop.eup %1675 }
 0x2a2   : > { %1533 = vmatpush3.msk.msra.mxu0 %vm460_vm5, %v1676_v44 }
 0x2a3   : > { %1535 = vmatmul.mubr.msk.f32.vlgmr.msra.gmra.mxu0 %vm457_vm6, %v1875_v11 }
 0x2a4   : > { %1544 = vmatprep.mubr.msk.f32.mxu0 %vm377_vm4, %v633_v37 }
 0x363   : > { %v530_v49 = vpop.f32.mrf.mxu0 }
 0x364   : > { %v531_v50 = vadd.f32 %v530_v49, %v455_v48 }
 0x365   : > { %v1536_v51 = vpop.f32.mrf.mxu0 }
 0x366   : > { %v1965_v52 = vrot.slane %v531_v50, %v1962_v47  ;;  %1336 = vst [vmem:[%s1967_s25 + $0x1d] sm:$0x1] %v531_v50 }
 0x368   : > { %v544_v54 = vmul.f32 %v1965_v52, %v538_v53 }
 0x36a   : > { %v549_v56 = vadd.f32 %v547_v55, %v544_v54 }
 0x36c   : > { %1677 = vtanh.f32 %v549_v56 }
 0x379   : > { %v1678_v57 = vpop.eup %1677 }
 0x37a   : > { %1538 = vmatpush3.msk.msra.mxu1 %vm460_vm5, %v1678_v57  ;;  %v1193_v57 = vpop.permute.xlu1 %1192 }
 0x37b   : > { %1540 = vmatmul.mubr.msk.f32.vlgmr.msra.gmra.mxu1 %vm457_vm6, %v551_v34 }
 0x37c   : > { %1551 = vmatprep.mubr.msk.f32.mxu1 %vm297_vm3, %v726_v39 }
 0x43b   : > { %v628_v59 = vpop.f32.mrf.mxu1 }
 0x43c   : > { %v629_v60 = vadd.f32 %v628_v59, %v555_v58 }
 0x43d   : > { %v1541_v61 = vpop.f32.mrf.mxu1 }
 0x43e   : > { %1679 = vtanh.f32 %v629_v60  ;;  %v1178_v60 = vpop.permute.xlu1 %1177 }
 0x44b   : > { %v1680_v62 = vpop.eup %1679 }
 0x44c   : > { %1542 = vmatprep.subr.mxu0 %v1680_v62 }
 0x44d   : > { %1543 = vmatpush3.msra.mxu0 %v1680_v62 }
 0x44e   : > { %1545 = vmatmul.mubr.msk.f32.vlgmr.msra.gmra.mxu0 %vm377_vm4, %v1889_v13  ;;  %1557 = vmatprep.subr.mxu0 %v1764_v16  ;;  %v849_v13 = vmul.f32 %v1860_v8, %v1860_v8 }
 0x44f   : > { %1565 = vmatprep.mubr.msk.f32.mxu0 %vm1765_vm2, %v1764_v16  ;;  %1558 = vmatpush3.msk.msra.mxu0 %vm210_vm1, %v850_v12 }
 0x450   : > { %1559 = vmatprep.subr.mxu0 %v1764_v16 }
 0x451   : > { %1560 = vmatpush3.msra.mxu0 %v849_v13 }
 0x452   : > { %1561 = vmatprep.subr.mxu0 %v1764_v16 }
 0x50e   : > { %v1546_v0 = vpop.f32.mrf.mxu0 }
 0x50f   : > { %v721_v1 = vadd.f32 %v1546_v0, %v643_v63  ;;  %v1183_v0 = vpop.permute.xlu0 %1182 }
 0x510   : > { %v715_v3 = vpop.f32.mrf.mxu0 }
 0x511   : > { %1681 = vtanh.f32 %v721_v1  ;;  %v716_v4 = vadd.f32 %v715_v3, %v638_v2  ;;  %v1209_v1 = vpop.permute.xlu1 %1208 }
 0x513   : > { %1683 = vtanh.f32 %v716_v4 }
 0x51e   : > { %v1682_v5 = vpop.eup %1681 }
 0x51f   : > { %1547 = vmatprep.subr.mxu1 %v1682_v5 }
 0x520   : > { %v1684_v11 = vpop.eup %1683  ;;  %1548 = vmatpush3.msra.mxu1 %v1682_v5 }
 0x521   : > { %1549 = vmatprep.subr.mxu1 %v1684_v11 }
 0x522   : > { %1550 = vmatpush3.msra.mxu1 %v1684_v11  ;;  %v1189_v11 = vpop.permute.xlu0 %1188 }
 0x523   : > { %1552 = vmatmul.mubr.msk.f32.vlgmr.msra.gmra.mxu1 %vm297_vm3, %v1901_v15  ;;  %1568 = vmatprep.subr.mxu1 %v1764_v16  ;;  %v848_v15 = vmul.f32 %v1866_v9, %v1866_v9 }
 0x524   : > { %1554 = vmatprep.mubr.msk.f32.mxu1 %vm297_vm3, %v1948_v38 }
 0x525   : > { %1562 = vmatpush3.msra.mxu0 %v848_v15  ;;  %v1205_v15 = vpop.permute.xlu1 %1204 }
 0x526   : > { %1563 = vmatprep.subr.mxu0 %v1764_v16 }
 0x527   : > { %1555 = vmatmul.mubr.msk.f32.gmra.mxu1 %vm297_vm3, %v1895_v14  ;;  %v847_v14 = vmul.f32 %v1870_v10, %v1870_v10 }
 0x528   : > { %1576 = vmatprep.mubr.msk.f32.mxu1 %vm1765_vm2, %v1764_v16 }
 0x529   : > { %1564 = vmatpush3.msra.mxu0 %v847_v14  ;;  %v1185_v14 = vmul.f32 %v1178_v60, %v1965_v52 }
 0x52a   : > { %1579 = vmatprep.subr.mxu0 %v1764_v16  ;;  %1566 = vmatmul.mubr.msk.f32.vlgmr.msra.gmra.mxu0 %vm205_vm0, %v1768_v17 }
 0x52b   : > { %1587 = vmatprep.mubr.msk.f32.mxu0 %vm1765_vm2, %v1764_v16 }
 0x5e3   : > { %v1553_v23 = vpop.f32.mrf.mxu1 }
 0x5e4   : > { %v830_v24 = vadd.f32 %v1553_v23, %v738_v22 }
 0x5e5   : > { %v824_v26 = vpop.f32.mrf.mxu1 }
 0x5e6   : > { %1333 = vst [vmem:[%s1967_s25 + $0x8] sm:$0xff] %v830_v24  ;;  %v825_v6 = vadd.f32 %v824_v26, %v733_v25  ;;  %v928_v36 = vmul.f32 %v830_v24, %v830_v24  ;;  %v1005_v37 = vmul.f32 %v830_v24, %v1866_v9  ;;  %v844_v41 = vsub.f32 %v1866_v9, %v830_v24  ;;  %v1225_v25 = vpop.permute.xlu0 %1224 }
 0x5e7   : > { %v1556_v27 = vpop.f32.mrf.mxu1 }
 0x5e8   : > { %1332 = vst [vmem:[%s1967_s25] sm:$0xff] %v825_v6  ;;  %v840_v28 = vadd.f32 %v1556_v27, %v748_v20  ;;  %v927_v38 = vmul.f32 %v825_v6, %v825_v6  ;;  %v1004_v39 = vmul.f32 %v825_v6, %v1870_v10  ;;  %v843_v43 = vsub.f32 %v1870_v10, %v825_v6  ;;  %v1221_v27 = vpop.permute.xlu1 %1220 }
 0x5e9   : > { %v834_v29 = vpop.f32.mrf.mxu1 }
 0x5ea   : > { %v930_v30 = vmul.f32 %v840_v28, %v840_v28  ;;  %v1007_v31 = vmul.f32 %v840_v28, %v1858_v7  ;;  %1335 = vst [vmem:[%s1967_s25 + $0x18] sm:$0x1f] %v840_v28  ;;  %v835_v32 = vadd.f32 %v834_v29, %v743_v21  ;;  %v846_v35 = vsub.f32 %v1858_v7, %v840_v28  ;;  %v923_v10 = vpop.f32.mrf.mxu0 }
 0x5eb   : > { %v1081_v9 = vmul.f32 %v843_v43, %v843_v43  ;;  %v1166_v54 = vmax.f32 %v923_v10, 1e-24 }
 0x5ec   : > { %1334 = vst [vmem:[%s1967_s25 + $0x10] sm:$0xff] %v835_v32  ;;  %1569 = vmatpush3.msk.msra.mxu1 %vm210_vm1, %v930_v30  ;;  %1580 = vmatpush3.msk.msra.mxu0 %vm210_vm1, %v1007_v31  ;;  %v929_v33 = vmul.f32 %v835_v32, %v835_v32  ;;  %v1006_v34 = vmul.f32 %v835_v32, %v1860_v8  ;;  %v1567_v44 = vpop.f32.mrf.mxu0 }
 0x5ed   : > { %1570 = vmatprep.subr.mxu1 %v1764_v16  ;;  %1581 = vmatprep.subr.mxu0 %v1764_v16  ;;  %v845_v40 = vsub.f32 %v1860_v8, %v835_v32  ;;  %v1084_v7 = vmul.f32 %v846_v35, %v846_v35  ;;  %v1082_v8 = vmul.f32 %v844_v41, %v844_v41 }
 0x5ee   : > { %1571 = vmatpush3.msra.mxu1 %v929_v33  ;;  %1582 = vmatpush3.msra.mxu0 %v1006_v34 }
 0x5ef   : > { %1572 = vmatprep.subr.mxu1 %v1764_v16  ;;  %1583 = vmatprep.subr.mxu0 %v1764_v16  ;;  %v1083_v42 = vmul.f32 %v845_v40, %v845_v40 }
 0x5f0   : > { %1573 = vmatpush3.msra.mxu1 %v928_v36  ;;  %1584 = vmatpush3.msra.mxu0 %v1005_v37 }
 0x5f1   : > { %1574 = vmatprep.subr.mxu1 %v1764_v16  ;;  %1585 = vmatprep.subr.mxu0 %v1764_v16 }
 0x5f2   : > { %1575 = vmatpush3.msra.mxu1 %v927_v38  ;;  %1586 = vmatpush3.msra.mxu0 %v1004_v39 }
 0x5f3   : > { %1590 = vmatprep.subr.mxu1 %v1764_v16  ;;  %1577 = vmatmul.mubr.msk.f32.vlgmr.msra.gmra.mxu1 %vm205_vm0, %v1768_v17 }
 0x5f4   : > { %1591 = vmatpush3.msk.msra.mxu1 %vm210_vm1, %v1084_v7  ;;  %1598 = vmatprep.mubr.msk.f32.mxu1 %vm1765_vm2, %v1764_v16 }
 0x5f5   : > { %1592 = vmatprep.subr.mxu1 %v1764_v16  ;;  %1588 = vmatmul.mubr.msk.f32.vlgmr.msra.gmra.mxu0 %vm205_vm0, %v1768_v17 }
 0x5f6   : > { %1593 = vmatpush3.msra.mxu1 %v1083_v42  ;;  %1601 = vmatprep.subr.mxu0 %v1764_v16 }
 0x5f7   : > { %1594 = vmatprep.subr.mxu1 %v1764_v16  ;;  %1605 = vmatprep.mubr.msk.f32.mxu0 %vm1765_vm2, %v1764_v16 }
 0x5f8   : > { %1595 = vmatpush3.msra.mxu1 %v1082_v8 }
 0x5f9   : > { %1596 = vmatprep.subr.mxu1 %v1764_v16 }
 0x5fa   : > { %1597 = vmatpush3.msra.mxu1 %v1081_v9 }
 0x5fb   : > { %1599 = vmatmul.mubr.msk.f32.vlgmr.msra.gmra.mxu1 %vm205_vm0, %v1768_v17  ;;  %v1186_v17 = vmul.f32 %v1183_v0, %v1965_v52  ;;  %v1235_v52 = vpop.permute.xlu1 %1234 }
 0x6b3   : > { %v1000_v45 = vpop.f32.mrf.mxu1 }
 0x6b4   : > { %v1169_v46 = vmul.f32 %v1000_v45, %v923_v10 }
 0x6b5   : > { %v1578_v48 = vpop.f32.mrf.mxu1  ;;  %v1077_v49 = vpop.f32.mrf.mxu0 }
 0x6b6   : > { %v1170_v50 = vmax.f32 %v1169_v46, 1e-16 }
 0x6b7   : > { %v1589_v51 = vpop.f32.mrf.mxu0 }
 0x6b8   : > { %1685 = vrsqrt.f32 %v1170_v50 }
 0x6bb   : > { %v1154_v53 = vpop.f32.mrf.mxu1 }
 0x6bc   : > { %v1158_v55 = vmax.f32 %v1154_v53, 0.0 }
 0x6bd   : > { %v1600_v56 = vpop.f32.mrf.mxu1 }
 0x6be   : > { %1687 = vrsqrt.f32 %v1158_v55  ;;  %vm1161_vm7 = vcmp.eq.f32.partialorder %v1158_v55, inf  ;;  %v1164_v2 = vand.u32 2147483648, %v1158_v55  ;;  %vm1163_vm8 = vcmp.eq.f32.partialorder %v1158_v55, 0.0 }
 0x6bf   : > { %1689 = vrsqrt.f32 %v1166_v54 }
 0x6c5   : > { %v1686_v58 = vpop.eup %1685 }
 0x6c6   : > { %v1172_v59 = vmul.f32 %v1686_v58, %v1077_v49 }
 0x6c8   : > { %1338 = vst [vmem:[%s1967_s25 + $0x1f] sm:$0x1] %v1172_v59  ;;  %v1214_v12 = vrot.slane %v1172_v59, %v1962_v47 }
 0x6ca   : > { %v1215_v21 = vmul.f32 %v1214_v12, %v1205_v15  ;;  %v1216_v24 = vmul.f32 %v1214_v12, %v1209_v1 }
 0x6cb   : > { %v1688_v61 = vpop.eup %1687 }
 0x6cc   : > { %v1160_v62 = vmul.f32 %v1688_v61, %v1158_v55  ;;  %v1690_v63 = vpop.eup %1689 }
 0x6ce   : > { %v1162_v3 = vsel %vm1161_vm7, %v1158_v55, %v1160_v62 }
 0x6cf   : > { %v1165_v4 = vsel %vm1163_vm8, %v1164_v2, %v1162_v3 }
 0x6d0   : > { %v1168_v5 = vmul.f32 %v1690_v63, %v1165_v4 }
 0x6d2   : > { %v1198_v13 = vrot.slane %v1168_v5, %v1962_v47  ;;  %1337 = vst [vmem:[%s1967_s25 + $0x1e] sm:$0x1] %v1168_v5 }
 0x6d4   : > { %v1199_v18 = vmul.f32 %v1198_v13, %v1189_v11  ;;  %v1200_v20 = vmul.f32 %v1198_v13, %v1193_v57 }
 0x6d6   : > { %v1201_v22 = vadd.f32 %v1199_v18, %v1185_v14  ;;  %v1202_v23 = vadd.f32 %v1200_v20, %v1186_v17 }
 0x6d8   : > { %v1217_v26 = vadd.f32 %v1215_v21, %v1201_v22  ;;  %v1218_v6 = vadd.f32 %v1216_v24, %v1202_v23 }
 0x6da   : > { %v1228_v28 = vadd.f32 %v1225_v25, %v1218_v6  ;;  %v1227_v29 = vadd.f32 %v1221_v27, %v1217_v26 }
 0x6dc   : > { %1691 = vtanh.f32 %v1228_v28 }
 0x6dd   : > { %1693 = vtanh.f32 %v1227_v29 }
 0x6e9   : > { %v1692_v47 = vpop.eup %1691 }
 0x6ea   : > { %1602 = vmatpush3.msk.msra.mxu0 %vm1240_vm9, %v1692_v47  ;;  %v1694_v30 = vpop.eup %1693 }
 0x6eb   : > { %1603 = vmatprep.subr.mxu0 %v1764_v16 }
 0x6ec   : > { %1604 = vmatpush3.msra.mxu0 %v1694_v30 }
 0x6ed   : > { %1606 = vmatmul.mubr.msk.f32.vlgmr.msra.gmra.mxu0 %vm1237_vm10, %v2012_v19 }
 0x7ad   : > { %v1310_v31 = vpop.f32.mrf.mxu0 }
 0x7ae   : > { %v1311_v32 = vadd.f32 %v1310_v31, %v1235_v52 }
 0x7af   : > { %v1607_v33 = vpop.f32.mrf.mxu0 }
 0x7b0   : > { %v1315_v34 = vrot.slane %v1311_v32, 1 }
 0x7b2   : > { %v1317_v35 = vmax.f32 %v1311_v32, %v1315_v34 }
 0x7b4   : > { %v1318_v36 = vsub.f32 %v1311_v32, %v1317_v35  ;;  %v1322_v37 = vrot.slane %v1317_v35, 7 }
 0x7b6   : > { %v1324_v38 = vsub.f32 %v1311_v32, %v1322_v37  ;;  %v1319_v39 = vmul.f32 1.442695, %v1318_v36 }
 0x7b8   : > { %v1325_v40 = vmul.f32 1.442695, %v1324_v38 }
 0x7ba   : > { %1695 = vpow2.f32 %v1325_v40 }
 0x7bb   : > { %1697 = vpow2.f32 %v1319_v39 }
 0x7c7   : > { %v1696_v16 = vpop.eup %1695 }
 0x7c8   : > { %v1328_v19 = vrot.slane %v1696_v16, 1  ;;  %v1698_v7 = vpop.eup %1697 }
 0x7ca   : > { %v1330_v41 = vadd.f32 %v1698_v7, %v1328_v19 }
 0x7cc   : > { %1699 = vrcp.f32 %v1330_v41 }
 0x7d9   : > { %v1700_v42 = vpop.eup %1699 }
 0x7da   : > { %v1339_v43 = vmul.f32 %v1700_v42, %v1698_v7  ;;  %v1342_v8 = vrot.slane %v1700_v42, 7 }
 0x7dc   : > { %1340 = vst [vmem:[%s1967_s25 + $0x20] sm:$0x1] %v1339_v43  ;;  %v1344_v9 = vmul.f32 %v1696_v16, %v1342_v8 }
 0x7de   : > { %1345 = vst [vmem:[%s1967_s25 + $0x20] sm:$0x2] %v1344_v9 }
 0x7df   : > { %1714 = shalt.err (!%p1711_p5)
}
 0x7e0   : > { %s1715_s16 = scalar_lea.hbm %s2067_s5, 640  ;;  %s1719_s22 = scalar_lea.hbm %s2114_s2, 1280 }
 0x7e1   : > { %p1716_p7 = scmp.ne.s32.totalorder %s2067_s5, %s1715_s16  ;;  %p1720_p12 = scmp.lt.s32.totalorder %s2067_s5, %s2114_s2 }
 0x7e2   : > { %p1721_p13 = scmp.lt.s32.totalorder %s1719_s22, %s1715_s16 }
 0x7e3   : > { %p1717_p10 = pnand %p1716_p7, %p1827_p6 }
 0x7e4   : > { %p1722_p0 = por %p1721_p13, %p1720_p12 }
 0x7e5   : > { %p1718_p11 = pneg %p1717_p10 }
 0x7e7   : > { %p1723_p1 = pnand %p1722_p0, %p1718_p11 }
 0x7e9   : > { %1726 = shalt.err (!%p1723_p1)
}
 0x7ea   : > { %s1771_s25 = smov 128   ;;  %s1772_s26 = smov 256  }
 0x7eb   : > { %s1773_s27 = smov 8  }
 0x7ec   : > { %1609 = dma.vmem_to_hbm [thread:$0]  (%p1827_p6), %s2062_s29, 640, %s2067_s5, %s1347_s6, %s1771_s25, %s1772_s26, %s1773_s27  }
 0x7ed PF: > { %s1374_s30 = sand.u32 1, %s1749_s9   ;;  %p1612_p2 = pnand %p1429_p9, %p1831_p8 }
 0x7ee   : > { %s1375_s3 = scalar_lea.sflag [#allocation4], %s1374_s30 }
 0x7ef   : > { %p1613_p3 = pneg %p1612_p2 }
 0x7f1   : > { %1744 = dma.done.wait (%p1613_p3), %s1375_s3, 640  }
 0x7f2   : > { %1746 = vsyncadd (%p1613_p3), %s1375_s3, 4294966656  ;;  %p12_p4 = scmp.ge.s32.totalorder %s1812_s15, 4   ;;  %s2117_s9 = smov %s1753_s10 }
 0x7f3   : > { %s2118_s10 = smov %s1757_s11  ;;  %s2119_s11 = smov %s1825_s18 }
 0x7f4   : > { %s2120_s12 = smov %s1812_s15  ;;  %14 = sbr.rel (!%p12_p4) target bundleno = 3 (0x3), region = 106 }
 0x7f9   :  { %1380 = vsyncpa [#allocation4], 1 }
 0x7fa   :  { %1382 = vsyncpa [#allocation4 + $0x1], 1 }

</bundles_post_ra>
